<compile_context>
chip_gen: v7x
topology: tpu7x:2x2x1
jax: 0.10.0
libtpu: 0.0.40
codegen_flags: <defaults>
</compile_context>

<pallas_src>
import functools

import jax
import jax.numpy as jnp
from jax import lax
from jax.experimental import pallas as pl
from jax.experimental.pallas import tpu as pltpu

EPS = 1e-6

# Conservative per-step VMEM budget: ~75% of v7x's 64 MiB; also fine on
# v5e/v6e (128 MiB physical).
_VMEM_BUDGET = 48 << 20
_VMEM_HEADROOM = 8 << 20
_VMEM_FLOOR = 16 << 20
_VMEM_CAP = 56 << 20


def _gln_resident_kernel(eps, inv_n, x_ref, wb_ref, o_ref):
    """Whole (Bb, C, T) slab resident in VMEM: one stats sweep + one apply sweep."""
    # ---- stats sweep: both moments consumed from a single read of the block ----
    x = x_ref[...].astype(jnp.float32)                    # (Bb, C, T)
    row_s = jnp.sum(x, axis=-1, keepdims=True)            # lane reduce    (Bb, C, 1)
    row_ss = jnp.sum(x * x, axis=-1, keepdims=True)       # same sweep     (Bb, C, 1)
    s = jnp.sum(row_s, axis=1, keepdims=True)             # sublane reduce (Bb, 1, 1)
    ss = jnp.sum(row_ss, axis=1, keepdims=True)           # (Bb, 1, 1)

    mean = s * inv_n
    var = jnp.maximum(ss * inv_n - mean * mean, 0.0)      # clamp: f32 cancellation
    rstd = lax.rsqrt(var + eps)                           # EUP, not a VALU divide

    w = wb_ref[:, 0:1][None, :, :]                        # (1, C, 1)
    b = wb_ref[:, 1:2][None, :, :]
    scale = w * rstd                                      # (Bb, C, 1)
    shift = b - mean * scale

    # ---- apply sweep: fresh read/cast so no full-tile f32 temp stays live
    # (matters for bf16 inputs); single fused multiply-add over the slab.
    o_ref[...] = (x_ref[...].astype(jnp.float32) * scale + shift).astype(o_ref.dtype)


def _gln_tiled_kernel(eps, inv_n, x_ref, wb_ref, o_ref, sum_ref, ss_ref):
    """Two-phase T-tiled path: phase 0 = stats accumulation, phase 1 = apply."""
    phase = pl.program_id(1)
    t = pl.program_id(2)

    @pl.when(jnp.logical_and(phase == 0, t == 0))
    def _():
        sum_ref[...] = jnp.zeros_like(sum_ref)
        ss_ref[...] = jnp.zeros_like(ss_ref)

    @pl.when(phase == 0)
    def _():
        x = x_ref[0].astype(jnp.float32)                  # (C, tT)
        row_s = jnp.sum(x, axis=-1, keepdims=True)        # (C, 1), fused with below
        row_ss = jnp.sum(x * x, axis=-1, keepdims=True)   # (C, 1)
        sum_ref[...] += jnp.sum(row_s, axis=0, keepdims=True)   # (1, 1)
        ss_ref[...] += jnp.sum(row_ss, axis=0, keepdims=True)   # (1, 1)

    @pl.when(phase == 1)
    def _():
        mean = sum_ref[...] * inv_n                       # (1, 1)
        var = jnp.maximum(ss_ref[...] * inv_n - mean * mean, 0.0)
        rstd = lax.rsqrt(var + eps)                       # EUP
        w = wb_ref[:, 0:1]                                # (C, 1)
        b = wb_ref[:, 1:2]
        scale = w * rstd                                  # (C, 1)
        shift = b - mean * scale
        o_ref[0] = (x_ref[0].astype(jnp.float32) * scale + shift).astype(o_ref.dtype)


def global_layer_norm(x, weight, bias, *, eps=EPS, force_tiled=False, t_tile=None):
    """x: (B, C, T); weight/bias: (C,) (the PyTorch (1, C, 1) params squeezed)."""
    B, C, T = x.shape
    itemsize = x.dtype.itemsize

    # Pack the two per-channel param vectors into one (C, 2) slab -> single DMA.
    wb = jnp.concatenate(
        [weight.reshape(C, 1), bias.reshape(C, 1)], axis=1
    ).astype(jnp.float32)
    wb_bytes = 2 * wb.size * 4  # double-buffered
    inv_n = 1.0 / (C * T)

    def resident_footprint(bb):
        blk = bb * C * T * itemsize
        extra_f32 = bb * C * T * 4 if itemsize < 4 else 0   # cast temp cushion (bf16)
        return 4 * blk + extra_f32 + wb_bytes + (256 << 10)  # in+out, double-buffered

    # Largest batch-divisor block that fits the budget (amortizes step overhead).
    bb = None
    for d in range(1, B + 1):
        if B % d == 0 and resident_footprint(d) <= _VMEM_BUDGET:
            bb = d
    use_tiled = force_tiled or (bb is None)

    if not use_tiled:
        vmem_limit = int(min(max(resident_footprint(bb) + _VMEM_HEADROOM,
                                 _VMEM_FLOOR), _VMEM_CAP))
        cost = pl.CostEstimate(
            flops=6 * B * C * T,
            transcendentals=B,
            bytes_accessed=2 * B * C * T * itemsize + wb.size * 4,
        )
        return pl.pallas_call(
            functools.partial(_gln_resident_kernel, eps, inv_n),
            out_shape=jax.ShapeDtypeStruct((B, C, T), x.dtype),
            grid_spec=pltpu.PrefetchScalarGridSpec(
                num_scalar_prefetch=0,
                grid=(B // bb,),
                in_specs=[
                    pl.BlockSpec((bb, C, T), lambda i: (i, 0, 0)),
                    pl.BlockSpec((C, 2), lambda i: (0, 0)),
                ],
                out_specs=pl.BlockSpec((bb, C, T), lambda i: (i, 0, 0)),
            ),
            compiler_params=pltpu.CompilerParams(
                dimension_semantics=("parallel",),
                vmem_limit_bytes=vmem_limit,
            ),
            cost_estimate=cost,
        )(x, wb)

    # ---------------- tiled two-phase fallback (large C*T / v7x) ----------------
    def tiled_footprint(tt):
        blk = C * tt * itemsize
        extra_f32 = C * tt * 4 if itemsize < 4 else 0
        return 4 * blk + extra_f32 + wb_bytes + (256 << 10)

    if t_tile is not None:
        tt = t_tile
    else:
        cands = [d for d in range(128, T + 1, 128) if T % d == 0] or [T]
        fitting = [d for d in cands if tiled_footprint(d) <= _VMEM_BUDGET]
        tt = max(fitting) if fitting else min(cands)
        # TODO(synk): if even the smallest lane-aligned T tile exceeds the VMEM
        # budget (enormous C), add a C-tiled variant on top of the T tiling.
    assert T % tt == 0, "t_tile must divide T"
    n_t = T // tt

    vmem_limit = int(min(max(tiled_footprint(tt) + _VMEM_HEADROOM,
                             _VMEM_FLOOR), _VMEM_CAP))
    cost = pl.CostEstimate(
        flops=6 * B * C * T,
        transcendentals=B * n_t,
        bytes_accessed=3 * B * C * T * itemsize + wb.size * 4,
    )
    return pl.pallas_call(
        functools.partial(_gln_tiled_kernel, eps, inv_n),
        out_shape=jax.ShapeDtypeStruct((B, C, T), x.dtype),
        grid_spec=pltpu.PrefetchScalarGridSpec(
            num_scalar_prefetch=0,
            grid=(B, 2, n_t),
            in_specs=[
                pl.BlockSpec((1, C, tt), lambda b, p, t: (b, 0, t)),
                pl.BlockSpec((C, 2), lambda b, p, t: (0, 0)),
            ],
            # Phase 0 keeps the output block index pinned at (b, 0, 0) so no
            # writeback happens until phase 1 writes real data tile-by-tile.
            out_specs=pl.BlockSpec((1, C, tt), lambda b, p, t: (b, 0, t * p)),
            scratch_shapes=[
                pltpu.VMEM((1, 1), jnp.float32),   # running sum
                pltpu.VMEM((1, 1), jnp.float32),   # running sum of squares
            ],
        ),
        compiler_params=pltpu.CompilerParams(
            dimension_semantics=("parallel", "arbitrary", "arbitrary"),
            vmem_limit_bytes=vmem_limit,
        ),
        cost_estimate=cost,
    )(x, wb)


def ref_forward(x, weight, bias, eps=EPS):
    """Pure-JAX reference mirroring the PyTorch forward exactly."""
    mean = x.mean(axis=(1, 2), keepdims=True)
    std = jnp.sqrt(((x - mean) ** 2).mean(axis=(1, 2), keepdims=True) + eps)
    y = (x - mean) / std
    return weight[None, :, None] * y + bias[None, :, None]


if __name__ == "__main__":
    # Small shapes consistent with the module; T is a multiple of 128 so blocks
    # are lane-dense and stores are unmasked.
    B, C, T = 2, 8, 256

    key = jax.random.PRNGKey(0)
    kx, kw = jax.random.split(key)
    x = jax.random.normal(kx, (B, C, T), jnp.float32)
    weight = jax.random.normal(kw, (C,), jnp.float32)   # torch.randn(1, C, 1)
    bias = jnp.zeros((C,), jnp.float32)                 # torch.zeros(1, C, 1)

    ref = ref_forward(x, weight, bias)

    # Resident (default) path.
    out = jax.block_until_ready(global_layer_norm(x, weight, bias))
    assert out.shape == (B, C, T)
    assert jnp.allclose(out, ref, rtol=1e-4, atol=1e-4), \
        f"resident path: max abs diff {jnp.max(jnp.abs(out - ref))}"

    # Exercise the tiled two-phase (large-shape / v7x) path on the same inputs.
    out_tiled = jax.block_until_ready(
        global_layer_norm(x, weight, bias, force_tiled=True, t_tile=128))
    assert jnp.allclose(out_tiled, ref, rtol=1e-4, atol=1e-4), \
        f"tiled path: max abs diff {jnp.max(jnp.abs(out_tiled - ref))}"

    print("KERNEL_OK")
</pallas_src>

<mosaic_0001>
module attributes {stable_mosaic.version = 11 : i64} {
  func.func @_gln_resident_kernel(%arg0: i32, %arg1: memref<2x8x256xf32, #tpu.memory_space<vmem>>, %arg2: memref<8x2xf32, #tpu.memory_space<vmem>>, %arg3: memref<2x8x256xf32, #tpu.memory_space<vmem>>) attributes {dimension_semantics = [#tpu.dimension_semantics<parallel>], iteration_bounds = array<i64: 1>, scalar_prefetch = 0 : i64, scratch_operands = 0 : i64, tpu.core_type = #tpu.core_type<tc>, window_params = [{transform_indices = @transform_0, window_bounds = array<i64: 2, 8, 256>}, {pipeline_mode = #tpu.pipeline_mode<synchronous>, transform_indices = @transform_1, window_bounds = array<i64: 8, 2>}, {transform_indices = @transform_2, window_bounds = array<i64: 2, 8, 256>}]} {
    %c0 = arith.constant 0 : index
    %c0_0 = arith.constant 0 : index
    %c0_1 = arith.constant 0 : index
    %0 = vector.load %arg1[%c0, %c0_0, %c0_1] : memref<2x8x256xf32, #tpu.memory_space<vmem>>, vector<2x8x256xf32>
    %cst = arith.constant dense<0.000000e+00> : vector<2x8xf32>
    %1 = vector.multi_reduction <add>, %0, %cst [2] : vector<2x8x256xf32> to vector<2x8xf32>
    %2 = vector.shape_cast %1 : vector<2x8xf32> to vector<2x8x1xf32>
    %3 = arith.mulf %0, %0 : vector<2x8x256xf32>
    %cst_2 = arith.constant dense<0.000000e+00> : vector<2x8xf32>
    %4 = vector.multi_reduction <add>, %3, %cst_2 [2] : vector<2x8x256xf32> to vector<2x8xf32>
    %5 = vector.shape_cast %4 : vector<2x8xf32> to vector<2x8x1xf32>
    %cst_3 = arith.constant dense<0.000000e+00> : vector<2x1xf32>
    %6 = vector.multi_reduction <add>, %2, %cst_3 [1] : vector<2x8x1xf32> to vector<2x1xf32>
    %7 = vector.shape_cast %6 : vector<2x1xf32> to vector<2x1x1xf32>
    %cst_4 = arith.constant dense<0.000000e+00> : vector<2x1xf32>
    %8 = vector.multi_reduction <add>, %5, %cst_4 [1] : vector<2x8x1xf32> to vector<2x1xf32>
    %9 = vector.shape_cast %8 : vector<2x1xf32> to vector<2x1x1xf32>
    %cst_5 = arith.constant 4.8828125E-4 : f32
    %10 = vector.broadcast %cst_5 : f32 to vector<2x1x1xf32>
    %11 = arith.mulf %7, %10 : vector<2x1x1xf32>
    %cst_6 = arith.constant 4.8828125E-4 : f32
    %12 = vector.broadcast %cst_6 : f32 to vector<2x1x1xf32>
    %13 = arith.mulf %9, %12 : vector<2x1x1xf32>
    %14 = arith.mulf %11, %11 : vector<2x1x1xf32>
    %15 = arith.subf %13, %14 : vector<2x1x1xf32>
    %cst_7 = arith.constant 0.000000e+00 : f32
    %16 = vector.broadcast %cst_7 : f32 to vector<2x1x1xf32>
    %17 = arith.maximumf %15, %16 : vector<2x1x1xf32>
    %cst_8 = arith.constant 9.99999997E-7 : f32
    %18 = vector.broadcast %cst_8 : f32 to vector<2x1x1xf32>
    %19 = arith.addf %17, %18 : vector<2x1x1xf32>
    %20 = math.rsqrt %19 : vector<2x1x1xf32>
    %c0_9 = arith.constant 0 : index
    %c0_10 = arith.constant 0 : index
    %21 = vector.load %arg2[%c0_9, %c0_10] : memref<8x2xf32, #tpu.memory_space<vmem>>, vector<8x1xf32>
    %22 = vector.shape_cast %21 : vector<8x1xf32> to vector<1x8x1xf32>
    %c0_11 = arith.constant 0 : index
    %c1 = arith.constant 1 : index
    %23 = vector.load %arg2[%c0_11, %c1] : memref<8x2xf32, #tpu.memory_space<vmem>>, vector<8x1xf32>
    %24 = vector.shape_cast %23 : vector<8x1xf32> to vector<1x8x1xf32>
    %25 = vector.broadcast %22 : vector<1x8x1xf32> to vector<2x8x1xf32>
    %26 = vector.broadcast %20 : vector<2x1x1xf32> to vector<2x8x1xf32>
    %27 = arith.mulf %25, %26 : vector<2x8x1xf32>
    %28 = vector.broadcast %11 : vector<2x1x1xf32> to vector<2x8x1xf32>
    %29 = arith.mulf %28, %27 : vector<2x8x1xf32>
    %30 = vector.broadcast %24 : vector<1x8x1xf32> to vector<2x8x1xf32>
    %31 = arith.subf %30, %29 : vector<2x8x1xf32>
    %c0_12 = arith.constant 0 : index
    %c0_13 = arith.constant 0 : index
    %c0_14 = arith.constant 0 : index
    %32 = vector.load %arg1[%c0_12, %c0_13, %c0_14] : memref<2x8x256xf32, #tpu.memory_space<vmem>>, vector<2x8x256xf32>
    %33 = vector.broadcast %27 : vector<2x8x1xf32> to vector<2x8x256xf32>
    %34 = arith.mulf %32, %33 : vector<2x8x256xf32>
    %35 = vector.broadcast %31 : vector<2x8x1xf32> to vector<2x8x256xf32>
    %36 = arith.addf %34, %35 : vector<2x8x256xf32>
    %c0_15 = arith.constant 0 : index
    %c0_16 = arith.constant 0 : index
    %c0_17 = arith.constant 0 : index
    %37 = vector.load %arg3[%c0_15, %c0_16, %c0_17] : memref<2x8x256xf32, #tpu.memory_space<vmem>>, vector<2x8x256xf32>
    tpu.vector_store %arg3[%c0_15, %c0_16, %c0_17], %36 {strides = array<i32>} : memref<2x8x256xf32, #tpu.memory_space<vmem>>, vector<2x8x256xf32>,
    return
  }
  func.func @transform_0(%arg0: i32) -> (i32, i32, i32) {
    %c0_i32 = arith.constant 0 : i32
    %c0_i32_0 = arith.constant 0 : i32
    %c0_i32_1 = arith.constant 0 : i32
    return %arg0, %c0_i32, %c0_i32_0 : i32, i32, i32
  }
  func.func @transform_1(%arg0: i32) -> (i32, i32) {
    %c0_i32 = arith.constant 0 : i32
    %c0_i32_0 = arith.constant 0 : i32
    %c0_i32_1 = arith.constant 0 : i32
    return %c0_i32, %c0_i32_0 : i32, i32
  }
  func.func @transform_2(%arg0: i32) -> (i32, i32, i32) {
    %c0_i32 = arith.constant 0 : i32
    %c0_i32_0 = arith.constant 0 : i32
    %c0_i32_1 = arith.constant 0 : i32
    return %arg0, %c0_i32, %c0_i32_0 : i32, i32, i32
  }
}

</mosaic_0001>

<bundles_post_ra>
// kernel: tpu_custom_call.1
= control target key start
LH: loop header
LB: loop body
LE: loop exit
PB: predicated region body
PF: predicated region fallthrough
CT: control target
= control target key end

     0   :  { %7 = vsyncpa [#allocation3], 0  ;;  %s289_s0 = inlined_call_operand.hbm [shape: f32[2,8,256], index: 0, kind: input, shape index: {}]   ;;  %s290_s1 = inlined_call_operand.vmem [shape: f32[8,2], index: 1, kind: input, shape index: {}]   ;;  %s291_s2 = inlined_call_operand.hbm [shape: f32[2,8,256], index: 2, kind: output, shape index: {}]  }
   0x1   :  { %8 = vsyncpa [#allocation4], 0  ;;  %s210_s9 = smov [#allocation2]   ;;  %s162_s13 = scalar_lea.hbm %s289_s0, 512 }
   0x2   :  { %s14_s10 = sshll.u32 %s210_s9, 4  ;;  %p163_p0 = scmp.ne.s32.totalorder %s289_s0, %s162_s13  ;;  %s15_s10 = int_to_ptr.vmem [resolvable:$true] %s14_s10 }
   0x3   :  { %p166_p1 = scmp.lt.u32.totalorder %s162_s13, %s289_s0 }
   0x5   :  { %p168_p2 = pnand %p166_p1, %p163_p0 }
   0x7   :  { %171 = shalt.err (!%p168_p2)
}
   0x8   :  { %s172_s18 = scalar_lea.vmem %s15_s10, 512  ;;  %p177_p4 = scmp.lt.s32.totalorder %s15_s10, %s15_s10 }
   0x9   :  { %p173_p3 = scmp.ne.s32.totalorder %s15_s10, %s172_s18  ;;  %p178_p5 = scmp.lt.s32.totalorder %s172_s18, %s172_s18 }
   0xb   :  { %p179_p6 = por %p178_p5, %p177_p4 }
   0xd   :  { %p180_p7 = pnand %p179_p6, %p173_p3 }
   0xf   :  { %183 = shalt.err (!%p180_p7)
}
  0x10   :  { %s211_s19 = smov 256   ;;  %s212_s20 = smov 16  }
  0x11   :  { %20 = dma.hbm_to_vmem [thread:$0]  %s289_s0, 512, %s15_s10, [#allocation3], %s211_s19, %s211_s19, %s212_s20  }
  0x12   :  { %206 = dma.done.wait [#allocation3], 512  }
  0x13   :  { %207 = vsyncadd [#allocation3], 4294966784  ;;  %v247_v0 = vld [vmem:[#allocation2] sm:$0xff]  ;;  %v249_v1 = vld [vmem:[#allocation2 + $0x8] sm:$0xff]  ;;  %v213_v12 = vmov 0   ;;  %v214_v53 = vmov 1  }
  0x14   :  { %v251_v2 = vld [vmem:[#allocation2 + $0x10] sm:$0xff]  ;;  %v30_v3 = vadd.f32 %v249_v1, %v247_v0  ;;  %v36_v4 = vmul.f32 %v247_v0, %v247_v0  ;;  %v37_v5 = vmul.f32 %v249_v1, %v249_v1  ;;  %v259_v6 = vld [vmem:[#allocation2 + $0x18] sm:$0xff]  ;;  %155 = vset.pattern.permute.xlu1 %v213_v12  ;;  %156 = vset.pattern.permute.xlu0 %v214_v53  ;;  %v84_v54 = vld [vmem:[%s290_s1] sm:$0xff]  ;;  %s215_s24 = smov 1   ;;  %s216_s1 = smov [#allocation5]  }
  0x15   :  { %v38_v7 = vmul.f32 %v251_v2, %v251_v2  ;;  %v39_v8 = vmul.f32 %v259_v6, %v259_v6  ;;  %v33_v10 = vadd.f32 %v259_v6, %v251_v2  ;;  %s136_s25 = sshll.u32 %s216_s1, 4  ;;  %s137_s25 = int_to_ptr.vmem [resolvable:$true] %s136_s25 }
  0x16   :  { %31 = vadd.xlane.f32.xlu0 %v30_v3  ;;  %v40_v9 = vadd.f32 %v37_v5, %v36_v4  ;;  %s184_s26 = scalar_lea.vmem %s137_s25, 512  ;;  %p189_p9 = scmp.lt.s32.totalorder %s137_s25, %s137_s25 }
  0x17   :  { %v43_v11 = vadd.f32 %v39_v8, %v38_v7  ;;  %p185_p8 = scmp.ne.s32.totalorder %s137_s25, %s184_s26  ;;  %p190_p10 = scmp.lt.s32.totalorder %s184_s26, %s184_s26 }
  0x18   :  { %41 = vadd.xlane.f32.xlu1 %v40_v9 }
  0x19   :  { %p191_p11 = por %p190_p10, %p189_p9 }
  0x1a   :  { %34 = vadd.xlane.f32.xlu0 %v33_v10 }
  0x1b   :  { %p192_p12 = pnand %p191_p11, %p185_p8 }
  0x1c   :  { %44 = vadd.xlane.f32.xlu1 %v43_v11 }
  0xa3   :  { %v32_v13 = vpop.xlane.xlu0 %31 }
  0xa4   :  { %v46_v14 = vrot.slane %v32_v13, 4 }
  0xa5   :  { %v42_v15 = vpop.xlane.xlu1 %41 }
  0xa6   :  { %v47_v16 = vadd.f32 %v46_v14, %v32_v13  ;;  %v58_v17 = vrot.slane %v42_v15, 4 }
  0xa7   :  { %v35_v18 = vpop.xlane.xlu0 %34 }
  0xa8   :  { %v48_v19 = vrot.slane %v47_v16, 2  ;;  %v59_v20 = vadd.f32 %v58_v17, %v42_v15  ;;  %v52_v21 = vrot.slane %v35_v18, 4 }
  0xa9   :  { %v45_v22 = vpop.xlane.xlu1 %44 }
  0xaa   :  { %v49_v23 = vadd.f32 %v48_v19, %v47_v16  ;;  %v60_v24 = vrot.slane %v59_v20, 2  ;;  %v53_v25 = vadd.f32 %v52_v21, %v35_v18  ;;  %v64_v26 = vrot.slane %v45_v22, 4 }
  0xac   :  { %v50_v27 = vrot.slane %v49_v23, 1  ;;  %v61_v28 = vadd.f32 %v60_v24, %v59_v20  ;;  %v54_v29 = vrot.slane %v53_v25, 2  ;;  %v65_v30 = vadd.f32 %v64_v26, %v45_v22 }
  0xae   :  { %v51_v31 = vadd.f32 %v50_v27, %v49_v23  ;;  %v62_v32 = vrot.slane %v61_v28, 1  ;;  %v55_v33 = vadd.f32 %v54_v29, %v53_v25  ;;  %v66_v34 = vrot.slane %v65_v30, 2 }
  0xb0   :  { %v63_v35 = vadd.f32 %v62_v32, %v61_v28  ;;  %v56_v36 = vrot.slane %v55_v33, 1  ;;  %v67_v37 = vadd.f32 %v66_v34, %v65_v30  ;;  %v70_v38 = vmul.f32 0.00048828125, %v51_v31 }
  0xb2   :  { %v72_v39 = vmul.f32 0.00048828125, %v63_v35  ;;  %v57_v40 = vadd.f32 %v56_v36, %v55_v33  ;;  %v68_v41 = vrot.slane %v67_v37, 1  ;;  %v74_v42 = vmul.f32 %v70_v38, %v70_v38 }
  0xb4   :  { %v69_v43 = vadd.f32 %v68_v41, %v67_v37  ;;  %v76_v44 = vsub.f32 %v72_v39, %v74_v42  ;;  %v71_v45 = vmul.f32 0.00048828125, %v57_v40 }
  0xb6   :  { %v73_v46 = vmul.f32 0.00048828125, %v69_v43  ;;  %v78_v47 = vmax.f32 %v76_v44, 0.0  ;;  %v75_v48 = vmul.f32 %v71_v45, %v71_v45 }
  0xb8   :  { %v80_v49 = vadd.f32 1e-06, %v78_v47  ;;  %v77_v50 = vsub.f32 %v73_v46, %v75_v48 }
  0xba   :  { %158 = vrsqrt.f32 %v80_v49  ;;  %v79_v51 = vmax.f32 %v77_v50, 0.0 }
  0xbc   :  { %v81_v52 = vadd.f32 1e-06, %v79_v51 }
  0xbe   :  { %160 = vrsqrt.f32 %v81_v52 }
  0xc4   :  { %v159_v55 = vpop.eup %158 }
  0xc5   :  { %v85_v56 = vmul.f32 %v159_v55, %v84_v54 }
  0xc7   :  { %v87_v57 = vmul.f32 %v85_v56, %v70_v38 }
  0xc8   :  { %v161_v58 = vpop.eup %160 }
  0xc9   :  { %91 = vrot.lane.b32.xlu0 %v87_v57, %s215_s24  ;;  %v86_v59 = vmul.f32 %v161_v58, %v84_v54 }
  0xcb   :  { %v88_v60 = vmul.f32 %v86_v59, %v71_v45 }
  0xcd   :  { %93 = vrot.lane.b32.xlu1 %v88_v60, %s215_s24 }
  0xd1   :  { %101 = vperm.xlu1 %155, %v85_v56  }
  0xd5   :  { %106 = vperm.xlu1 %155, %v86_v59  }
  0xd9   :  { %157 = vset.pattern.permute.xlu1 %v214_v53 }
 0x13b   :  { %v92_v61 = vpop.permute.xlu0 %91 }
 0x13c   :  { %v97_v62 = vsub.f32 %v84_v54, %v92_v61 }
 0x13e   :  { %115 = vperm.xlu0 %156, %v97_v62  }
 0x13f   :  { %v94_v63 = vpop.permute.xlu1 %93 }
 0x140   :  { %v98_v3 = vsub.f32 %v84_v54, %v94_v63 }
 0x142   :  { %120 = vperm.xlu1 %157, %v98_v3  }
 0x150   :  { %v102_v4 = vpop.permute.xlu1 %101 }
 0x151   :  { %v109_v5 = vmul.f32 %v102_v4, %v247_v0  ;;  %v110_v7 = vmul.f32 %v102_v4, %v249_v1 }
 0x154   :  { %v107_v8 = vpop.permute.xlu1 %106 }
 0x155   :  { %v111_v12 = vmul.f32 %v107_v8, %v251_v2  ;;  %v112_v13 = vmul.f32 %v107_v8, %v259_v6 }
 0x1bd   :  { %v116_v9 = vpop.permute.xlu0 %115 }
 0x1be   :  { %v123_v10 = vadd.f32 %v116_v9, %v109_v5  ;;  %v124_v11 = vadd.f32 %v116_v9, %v110_v7 }
 0x1c0   :  { %127 = vst [vmem:[#allocation5] sm:$0xff] %v123_v10  ;;  %128 = vst [vmem:[#allocation5 + $0x8] sm:$0xff] %v124_v11 }
 0x1c1   :  { %v121_v14 = vpop.permute.xlu1 %120 }
 0x1c2   :  { %v125_v15 = vadd.f32 %v121_v14, %v111_v12  ;;  %v126_v16 = vadd.f32 %v121_v14, %v112_v13 }
 0x1c4   :  { %129 = vst [vmem:[#allocation5 + $0x10] sm:$0xff] %v125_v15  ;;  %130 = vst [vmem:[#allocation5 + $0x18] sm:$0xff] %v126_v16 }
 0x1c5   :  { %195 = shalt.err (!%p192_p12)
}
 0x1c6   :  { %s196_s29 = scalar_lea.hbm %s291_s2, 512 }
 0x1c7   :  { %p197_p13 = scmp.ne.s32.totalorder %s291_s2, %s196_s29  ;;  %p200_p0 = scmp.lt.u32.totalorder %s196_s29, %s291_s2 }
 0x1c9   :  { %p202_p1 = pnand %p200_p0, %p197_p13 }
 0x1cb   :  { %205 = shalt.err (!%p202_p1)
}
 0x1cc   :  { %142 = dma.vmem_to_hbm [thread:$0]  %s137_s25, 512, %s291_s2, [#allocation4], %s211_s19, %s211_s19, %s212_s20  }
 0x1cd   :  { %208 = dma.done.wait [#allocation4], 512  }
 0x1ce   :  { %209 = vsyncadd [#allocation4], 4294966784 }
 0x1cf   :  { %146 = vsyncpa [#allocation3], 1 }
 0x1d0   :  { %147 = vsyncpa [#allocation4], 1 }

</bundles_post_ra>
